<compile_context>
chip_gen: v6e
topology: v6e:2x2x1
jax: 0.10.0
libtpu: 0.0.40
codegen_flags: <defaults>
</compile_context>

<pallas_src>
import jax
import jax.numpy as jnp
from jax.experimental import pallas as pl
from jax.experimental.pallas import tpu as pltpu


def _softmax_kernel(x_ref, o_ref):
    """Numerically stable softmax along the last (lane) axis of the block."""
    x = x_ref[...]
    if x.dtype != jnp.float32:
        # f32 accumulate for bf16 / fp8 inputs (mandatory on v5e: no bf16 VPU/EUP).
        x = x.astype(jnp.float32)
    m = jnp.max(x, axis=-1, keepdims=True)
    e = jnp.exp(x - m)
    s = jnp.sum(e, axis=-1, keepdims=True)
    out = e * pl.reciprocal(s)  # exact reciprocal keeps full f32 precision
    if out.dtype != o_ref.dtype:
        out = out.astype(o_ref.dtype)
    o_ref[...] = out


def _choose_row_tile(rows, norm_size, itemsize):
    """Pick a sublane-aligned row tile targeting ~2 MiB per in/out block."""
    align = max(8, 32 // itemsize)            # 8 (4B), 16 (2B), 32 (1B) sublanes
    target_block_bytes = 2 * 1024 * 1024      # ~2 MiB per buffer; 2 in + 2 out
    rt = target_block_bytes // max(1, norm_size * itemsize)
    rt = max(align, (rt // align) * align)
    # Keep >= ~8 grid steps when rows allow, so the megacore split (v7x: 2 TCs)
    # and the software pipeline stay busy even with large tiles.
    min_steps = 8
    while rt > align and rows > min_steps * align and pl.cdiv(rows, rt) < min_steps:
        rt = max(align, ((rt // 2) // align) * align)
    # Never use a tile larger than the (alignment-rounded) number of rows.
    rows_rounded = ((rows + align - 1) // align) * align
    return min(rt, rows_rounded)


def fusion_forward(x):
    """softmax(x * 1.0, axis=-1) over any leading shape, as a Pallas TPU kernel."""
    orig_shape = x.shape
    norm_size = orig_shape[-1]
    rows = 1
    for d in orig_shape[:-1]:
        rows *= d
    x2 = x.reshape(rows, norm_size)

    rt = _choose_row_tile(rows, norm_size, jnp.dtype(x.dtype).itemsize)
    grid = (pl.cdiv(rows, rt),)  # partial tail block (if any) is masked by Pallas

    out = pl.pallas_call(
        _softmax_kernel,
        out_shape=jax.ShapeDtypeStruct((rows, norm_size), x.dtype),
        grid_spec=pltpu.PrefetchScalarGridSpec(
            num_scalar_prefetch=0,
            grid=grid,
            in_specs=[pl.BlockSpec((rt, norm_size), lambda i: (i, 0))],
            out_specs=pl.BlockSpec((rt, norm_size), lambda i: (i, 0)),
        ),
        compiler_params=pltpu.CompilerParams(
            dimension_semantics=("parallel",),
            vmem_limit_bytes=32 * 1024 * 1024,  # >= default on v6e/v7x, raises v5e's 16 MiB
        ),
    )(x2)

    return out.reshape(orig_shape)


if __name__ == "__main__":
    # Module takes `norm_size`; forward is shape-agnostic softmax on dim=-1.
    # Example input consistent with the module: (batch=2, channels=4, seq=8, norm_size=32)
    key = jax.random.PRNGKey(0)
    x = jax.random.normal(key, (2, 4, 8, 32), dtype=jnp.float32)

    y = fusion_forward(x)
    y = jax.block_until_ready(y)

    # lightweight sanity check against plain-JAX reference
    ref = jax.nn.softmax(x * 1.0, axis=-1)
    assert y.shape == x.shape and y.dtype == x.dtype
    assert jnp.allclose(y, ref, atol=1e-5, rtol=1e-5)

    print("KERNEL_OK")
</pallas_src>

<mosaic_0001>
module attributes {stable_mosaic.version = 11 : i64} {
  func.func @_softmax_kernel(%arg0: i32, %arg1: memref<64x32xf32, #tpu.memory_space<vmem>>, %arg2: memref<64x32xf32, #tpu.memory_space<vmem>>) attributes {dimension_semantics = [#tpu.dimension_semantics<parallel>], iteration_bounds = array<i64: 1>, scalar_prefetch = 0 : i64, scratch_operands = 0 : i64, tpu.core_type = #tpu.core_type<tc>, window_params = [{transform_indices = @transform_0, window_bounds = array<i64: 64, 32>}, {transform_indices = @transform_1, window_bounds = array<i64: 64, 32>}]} {
    %c0 = arith.constant 0 : index
    %c0_0 = arith.constant 0 : index
    %0 = vector.load %arg1[%c0, %c0_0] : memref<64x32xf32, #tpu.memory_space<vmem>>, vector<64x32xf32>
    %cst = arith.constant dense<0xFF800000> : vector<64xf32>
    %1 = vector.multi_reduction <maximumf>, %0, %cst [1] : vector<64x32xf32> to vector<64xf32>
    %2 = vector.shape_cast %1 : vector<64xf32> to vector<64x1xf32>
    %3 = vector.broadcast %2 : vector<64x1xf32> to vector<64x32xf32>
    %4 = arith.subf %0, %3 : vector<64x32xf32>
    %5 = math.exp %4 : vector<64x32xf32>
    %cst_1 = arith.constant dense<0.000000e+00> : vector<64xf32>
    %6 = vector.multi_reduction <add>, %5, %cst_1 [1] : vector<64x32xf32> to vector<64xf32>
    %7 = vector.shape_cast %6 : vector<64xf32> to vector<64x1xf32>
    %8 = tpu.reciprocal %7 : vector<64x1xf32> -> vector<64x1xf32>
    %9 = vector.broadcast %8 : vector<64x1xf32> to vector<64x32xf32>
    %10 = arith.mulf %5, %9 : vector<64x32xf32>
    %c0_2 = arith.constant 0 : index
    %c0_3 = arith.constant 0 : index
    %11 = vector.load %arg2[%c0_2, %c0_3] : memref<64x32xf32, #tpu.memory_space<vmem>>, vector<64x32xf32>
    tpu.vector_store %arg2[%c0_2, %c0_3], %10 {strides = array<i32>} : memref<64x32xf32, #tpu.memory_space<vmem>>, vector<64x32xf32>,
    return
  }
  func.func @transform_0(%arg0: i32) -> (i32, i32) {
    %c0_i32 = arith.constant 0 : i32
    %c0_i32_0 = arith.constant 0 : i32
    return %arg0, %c0_i32 : i32, i32
  }
  func.func @transform_1(%arg0: i32) -> (i32, i32) {
    %c0_i32 = arith.constant 0 : i32
    %c0_i32_0 = arith.constant 0 : i32
    return %arg0, %c0_i32 : i32, i32
  }
}

</mosaic_0001>

<bundles_post_ra>
// kernel: tpu_custom_call.1
= control target key start
LH: loop header
LB: loop body
LE: loop exit
PB: predicated region body
PF: predicated region fallthrough
CT: control target
= control target key end

     0   :  { %vm16_vm0 = vcmask 261120   ;;  %s231_s0 = inlined_call_operand.vmem [shape: f32[64,32], index: 0, kind: input, shape index: {}]   ;;  %s232_s1 = inlined_call_operand.vmem [shape: f32[64,32], index: 1, kind: output, shape index: {}]  }
   0x1   :  { %v8_v0 = vld [vmem:[%s231_s0] sm:$0xff]  ;;  %v10_v1 = vld [vmem:[%s231_s0 + $0x10] sm:$0xff]  ;;  %v9_v2 = vld [vmem:[%s231_s0 + $0x8] sm:$0xff] }
   0x2   :  { %v17_v3 = vsel %vm16_vm0, %v8_v0, -inf  ;;  %v23_v4 = vsel %vm16_vm0, %v10_v1, -inf  ;;  %v11_v5 = vld [vmem:[%s231_s0 + $0x18] sm:$0xff]  ;;  %v20_v6 = vsel %vm16_vm0, %v9_v2, -inf  ;;  %v12_v8 = vld [vmem:[%s231_s0 + $0x20] sm:$0xff]  ;;  %v13_v9 = vld [vmem:[%s231_s0 + $0x28] sm:$0xff] }
   0x3   :  { %18 = vmax.xlane.f32.xlu0 %v17_v3  ;;  %24 = vmax.xlane.f32.xlu1 %v23_v4  ;;  %v26_v7 = vsel %vm16_vm0, %v11_v5, -inf  ;;  %v29_v10 = vsel %vm16_vm0, %v12_v8, -inf  ;;  %v32_v11 = vsel %vm16_vm0, %v13_v9, -inf  ;;  %v14_v12 = vld [vmem:[%s231_s0 + $0x30] sm:$0xff]  ;;  %v15_v13 = vld [vmem:[%s231_s0 + $0x38] sm:$0xff] }
   0x4   :  { %v35_v14 = vsel %vm16_vm0, %v14_v12, -inf  ;;  %v38_v15 = vsel %vm16_vm0, %v15_v13, -inf }
   0x7   :  { %21 = vmax.xlane.f32.xlu0 %v20_v6  ;;  %27 = vmax.xlane.f32.xlu1 %v26_v7 }
   0xb   :  { %30 = vmax.xlane.f32.xlu0 %v29_v10  ;;  %33 = vmax.xlane.f32.xlu1 %v32_v11 }
   0xf   :  { %36 = vmax.xlane.f32.xlu0 %v35_v14  ;;  %39 = vmax.xlane.f32.xlu1 %v38_v15 }
  0x8c   :  { %v19_v16 = vpop.xlane.xlu0 %18  ;;  %v25_v17 = vpop.xlane.xlu1 %24 }
  0x8d   :  { %v41_v18 = vsub.f32 %v8_v0, %v19_v16  ;;  %v43_v19 = vsub.f32 %v10_v1, %v25_v17 }
  0x8f   :  { %v49_v20 = vmul.f32 1.442695, %v41_v18  ;;  %v53_v21 = vmul.f32 1.442695, %v43_v19 }
  0x90   :  { %v22_v22 = vpop.xlane.xlu0 %21  ;;  %v28_v23 = vpop.xlane.xlu1 %27 }
  0x91   :  { %117 = vpow2.f32 %v49_v20  ;;  %v42_v24 = vsub.f32 %v9_v2, %v22_v22  ;;  %v44_v25 = vsub.f32 %v11_v5, %v28_v23 }
  0x92   :  { %119 = vpow2.f32 %v53_v21 }
  0x93   :  { %v51_v26 = vmul.f32 1.442695, %v42_v24  ;;  %v55_v27 = vmul.f32 1.442695, %v44_v25 }
  0x94   :  { %v31_v28 = vpop.xlane.xlu0 %30  ;;  %v34_v29 = vpop.xlane.xlu1 %33 }
  0x95   :  { %121 = vpow2.f32 %v51_v26  ;;  %v45_v30 = vsub.f32 %v12_v8, %v31_v28  ;;  %v46_v31 = vsub.f32 %v13_v9, %v34_v29 }
  0x96   :  { %123 = vpow2.f32 %v55_v27 }
  0x97   :  { %v57_v32 = vmul.f32 1.442695, %v45_v30  ;;  %v59_v33 = vmul.f32 1.442695, %v46_v31 }
  0x98   :  { %v37_v34 = vpop.xlane.xlu0 %36  ;;  %v40_v35 = vpop.xlane.xlu1 %39 }
  0x99   :  { %125 = vpow2.f32 %v57_v32  ;;  %v47_v36 = vsub.f32 %v14_v12, %v37_v34  ;;  %v48_v37 = vsub.f32 %v15_v13, %v40_v35 }
  0x9a   :  { %127 = vpow2.f32 %v59_v33 }
  0x9b   :  { %v61_v38 = vmul.f32 1.442695, %v47_v36  ;;  %v63_v39 = vmul.f32 1.442695, %v48_v37 }
  0x9d   :  { %129 = vpow2.f32 %v61_v38 }
  0x9e   :  { %v118_v40 = vpop.eup %117  ;;  %131 = vpow2.f32 %v63_v39 }
  0x9f   :  { %v120_v41 = vpop.eup %119  ;;  %v65_v42 = vsel %vm16_vm0, %v118_v40, 0.0 }
  0xa0   :  { %66 = vadd.xlane.f32.xlu0 %v65_v42  ;;  %v71_v43 = vsel %vm16_vm0, %v120_v41, 0.0 }
  0xa2   :  { %v122_v44 = vpop.eup %121 }
  0xa3   :  { %v124_v45 = vpop.eup %123  ;;  %v68_v46 = vsel %vm16_vm0, %v122_v44, 0.0 }
  0xa4   :  { %72 = vadd.xlane.f32.xlu0 %v71_v43  ;;  %69 = vadd.xlane.f32.xlu1 %v68_v46  ;;  %v74_v47 = vsel %vm16_vm0, %v124_v45, 0.0 }
  0xa6   :  { %v126_v48 = vpop.eup %125 }
  0xa7   :  { %v128_v49 = vpop.eup %127  ;;  %v77_v50 = vsel %vm16_vm0, %v126_v48, 0.0 }
  0xa8   :  { %75 = vadd.xlane.f32.xlu1 %v74_v47  ;;  %78 = vadd.xlane.f32.xlu0 %v77_v50  ;;  %v80_v51 = vsel %vm16_vm0, %v128_v49, 0.0 }
  0xaa   :  { %v130_v52 = vpop.eup %129 }
  0xab   :  { %v132_v53 = vpop.eup %131  ;;  %v83_v54 = vsel %vm16_vm0, %v130_v52, 0.0 }
  0xac   :  { %81 = vadd.xlane.f32.xlu1 %v80_v51  ;;  %84 = vadd.xlane.f32.xlu0 %v83_v54  ;;  %v86_v55 = vsel %vm16_vm0, %v132_v53, 0.0 }
  0xb0   :  { %87 = vadd.xlane.f32.xlu1 %v86_v55 }
 0x129   :  { %v67_v56 = vpop.xlane.xlu0 %66 }
 0x12a   :  { %133 = vrcp.f32 %v67_v56 }
 0x12d   :  { %v70_v57 = vpop.xlane.xlu1 %69  ;;  %v73_v58 = vpop.xlane.xlu0 %72 }
 0x12e   :  { %135 = vrcp.f32 %v70_v57 }
 0x12f   :  { %137 = vrcp.f32 %v73_v58 }
 0x131   :  { %v76_v59 = vpop.xlane.xlu1 %75  ;;  %v79_v60 = vpop.xlane.xlu0 %78 }
 0x132   :  { %139 = vrcp.f32 %v76_v59 }
 0x133   :  { %141 = vrcp.f32 %v79_v60 }
 0x135   :  { %v82_v61 = vpop.xlane.xlu1 %81  ;;  %v85_v62 = vpop.xlane.xlu0 %84 }
 0x136   :  { %143 = vrcp.f32 %v82_v61 }
 0x137   :  { %v134_v63 = vpop.eup %133  ;;  %145 = vrcp.f32 %v85_v62 }
 0x138   :  { %v97_v0 = vmul.f32 %v134_v63, %v118_v40 }
 0x139   :  { %v88_v1 = vpop.xlane.xlu1 %87 }
 0x13a   :  { %105 = vst.msk [vmem:[%s232_s1] sm:$0xff] %vm16_vm0, %v97_v0  ;;  %147 = vrcp.f32 %v88_v1 }
 0x13b   :  { %v136_v2 = vpop.eup %135 }
 0x13c   :  { %v138_v3 = vpop.eup %137  ;;  %v98_v4 = vmul.f32 %v136_v2, %v122_v44 }
 0x13d   :  { %v99_v5 = vmul.f32 %v138_v3, %v120_v41 }
 0x13e   :  { %106 = vst.msk [vmem:[%s232_s1 + $0x8] sm:$0xff] %vm16_vm0, %v98_v4 }
 0x13f   :  { %v140_v6 = vpop.eup %139  ;;  %107 = vst.msk [vmem:[%s232_s1 + $0x10] sm:$0xff] %vm16_vm0, %v99_v5 }
 0x140   :  { %v142_v7 = vpop.eup %141  ;;  %v100_v8 = vmul.f32 %v140_v6, %v124_v45 }
 0x141   :  { %v101_v9 = vmul.f32 %v142_v7, %v126_v48 }
 0x142   :  { %108 = vst.msk [vmem:[%s232_s1 + $0x18] sm:$0xff] %vm16_vm0, %v100_v8 }
 0x143   :  { %v144_v10 = vpop.eup %143  ;;  %109 = vst.msk [vmem:[%s232_s1 + $0x20] sm:$0xff] %vm16_vm0, %v101_v9 }
 0x144   :  { %v146_v11 = vpop.eup %145  ;;  %v102_v12 = vmul.f32 %v144_v10, %v128_v49 }
 0x145   :  { %v103_v13 = vmul.f32 %v146_v11, %v130_v52 }
 0x146   :  { %110 = vst.msk [vmem:[%s232_s1 + $0x28] sm:$0xff] %vm16_vm0, %v102_v12 }
 0x147   :  { %v148_v14 = vpop.eup %147  ;;  %111 = vst.msk [vmem:[%s232_s1 + $0x30] sm:$0xff] %vm16_vm0, %v103_v13 }
 0x148   :  { %v104_v15 = vmul.f32 %v148_v14, %v132_v53 }
 0x14a   :  { %112 = vst.msk [vmem:[%s232_s1 + $0x38] sm:$0xff] %vm16_vm0, %v104_v15 }

</bundles_post_ra>
